<compile_context>
chip_gen: v5e
topology: v5e:2x2
jax: 0.10.0
libtpu: 0.0.40
codegen_flags: <defaults>
</compile_context>

<pallas_src>
import math

import jax
import jax.numpy as jnp
from jax.experimental import pallas as pl
from jax.experimental.pallas import tpu as pltpu


# ----------------------------- helpers --------------------------------------


def _round_up(x: int, m: int) -> int:
    return ((x + m - 1) // m) * m


def _round_down(x: int, m: int) -> int:
    return (x // m) * m


def _vmem_capacity_bytes(default: int = 64 * 1024 * 1024) -> int:
    """Physical VMEM capacity of the local TensorCore (conservative fallback)."""
    try:
        info = pltpu.get_tpu_info()
        cap = getattr(info, "vmem_capacity_bytes", None)
        if cap:
            return int(cap)
    except Exception:
        pass
    return default  # 64 MiB: safe on every generation (v7x's physical size)


def _choose_seq_tile(s: int, per_row_vmem_bytes: int, budget_bytes: int,
                     *, align: int = 8, min_steps: int = 2) -> int:
    """Biggest seq tile whose double-buffered pipeline footprint fits `budget_bytes`,
    capped so the grid has >= `min_steps` steps (v7x megacore) when feasible, and
    rounded to a multiple of `align` (sublane layout / (8,128) rule) unless it
    covers the full sequence."""
    ts = max(1, budget_bytes // max(1, per_row_vmem_bytes))
    ts = min(ts, s)
    if s >= min_steps * align:
        ts = min(ts, _round_up(pl.cdiv(s, min_steps), align))
    if ts < s:
        ts = max(align, _round_down(ts, align))
        ts = min(ts, s)
    return ts


# ------------------------------ kernel --------------------------------------


def _pe_add_kernel(x_ref, pe_ref, o_ref):
    # 3-D path: (ts, b, d) + (ts, 1, d) broadcast over batch.
    # 2-D path: (ts, b*d) + (ts, b*d).
    o_ref[...] = x_ref[...] + pe_ref[...]
    # TODO(synk): training-mode dropout (pltpu.prng_seed + pltpu.prng_random_bits
    #             mask with 1/(1-p) rescale) not implemented; eval mode => identity.


# ------------------------------ module --------------------------------------


def make_positional_encoding(d_model: int, max_len: int = 512, dtype=jnp.float32):
    """Precompute the pe buffer exactly like the PyTorch module: (max_len, 1, d_model).

    NB: the reference module uses -log(3000.0)/d_model (not 10000.0); we match it.
    """
    assert d_model % 2 == 0, "PositionalEncoding requires an even d_model"
    position = jnp.arange(max_len, dtype=jnp.float32)[:, None]              # (max_len, 1)
    div_term = jnp.exp(
        jnp.arange(0, d_model, 2, dtype=jnp.float32) * (-math.log(3000.0) / d_model)
    )                                                                        # (d_model//2,)
    angles = position * div_term                                             # (max_len, d_model//2)
    pe = jnp.zeros((max_len, d_model), dtype=jnp.float32)
    pe = pe.at[:, 0::2].set(jnp.sin(angles))
    pe = pe.at[:, 1::2].set(jnp.cos(angles))
    return pe[:, None, :].astype(dtype)                                      # (max_len, 1, d_model)


def positional_encoding_forward(x, pe, *, vmem_budget_frac: float = 0.5,
                                donate_x: bool = False):
    """x: (seq_len, batch, d_model), pe: (max_len, 1, d_model) -> x + pe[:seq_len]."""
    s, b, d = x.shape
    assert s <= pe.shape[0], "seq_len exceeds max_len of the positional-encoding buffer"
    assert d == pe.shape[2], "d_model mismatch between x and pe"

    # Match PyTorch: the add promotes x/pe dtypes (no silent pe down-cast).
    out_dtype = jnp.promote_types(x.dtype, pe.dtype)
    x = x.astype(out_dtype)
    pe = pe.astype(out_dtype)
    itemsize = jnp.dtype(out_dtype).itemsize

    vmem_cap = _vmem_capacity_bytes()
    budget = int(vmem_cap * vmem_budget_frac)          # per-chip pipeline budget
    io_alias = {0: 0} if donate_x else {}

    lane_friendly_3d = (d % 128 == 0) and (b >= 8)

    if lane_friendly_3d:
        # ---- 3-D path: d on lanes, batch on sublanes, pe stays a broadcast tile ----
        # Per-row VMEM (double-buffered): 2 * (x + out + pe) with sublane padding.
        per_row = 2 * (2 * _round_up(b, 8) * d + 8 * d) * itemsize
        ts = _choose_seq_tile(s, per_row, budget)
        grid = (pl.cdiv(s, ts),)
        footprint = ts * per_row
        vmem_limit = min(int(0.9 * vmem_cap), max(footprint + (4 << 20), 32 << 20))

        out = pl.pallas_call(
            _pe_add_kernel,
            out_shape=jax.ShapeDtypeStruct((s, b, d), out_dtype),
            grid_spec=pltpu.PrefetchScalarGridSpec(
                num_scalar_prefetch=0,
                grid=grid,
                in_specs=[
                    pl.BlockSpec((ts, b, d), lambda i: (i, 0, 0)),   # x tile
                    pl.BlockSpec((ts, 1, d), lambda i: (i, 0, 0)),   # pe tile (rows < s only)
                ],
                out_specs=pl.BlockSpec((ts, b, d), lambda i: (i, 0, 0)),
            ),
            compiler_params=pltpu.CompilerParams(
                dimension_semantics=("parallel",),
                vmem_limit_bytes=vmem_limit,
            ),
            input_output_aliases=io_alias,
        )(x, pe)
        return out

    # ---- 2-D lane-folded path: fold batch onto the lane axis -> lane-dense stores,
    #      fully contiguous DMAs; used for awkward shapes (d % 128 != 0 or b < 8). ----
    bd = b * d
    x2 = x.reshape(s, bd)
    # One-time broadcast of pe over batch (pe2[s, i*d + j] == pe[s, 0, j]); tiny for
    # the shapes that take this path.
    pe2 = jnp.tile(pe[:s, 0, :], (1, b))                                     # (s, b*d)

    bd_pad = _round_up(bd, 128)
    per_row = 2 * 3 * bd_pad * itemsize                  # 2 buffers x (x + pe + out)
    ts = _choose_seq_tile(s, per_row, budget)
    grid = (pl.cdiv(s, ts),)
    footprint = ts * per_row
    vmem_limit = min(int(0.9 * vmem_cap), max(footprint + (4 << 20), 32 << 20))

    out2 = pl.pallas_call(
        _pe_add_kernel,
        out_shape=jax.ShapeDtypeStruct((s, bd), out_dtype),
        grid_spec=pltpu.PrefetchScalarGridSpec(
            num_scalar_prefetch=0,
            grid=grid,
            in_specs=[
                pl.BlockSpec((ts, bd), lambda i: (i, 0)),    # x tile, lane-dense
                pl.BlockSpec((ts, bd), lambda i: (i, 0)),    # pe tile, lane-dense
            ],
            out_specs=pl.BlockSpec((ts, bd), lambda i: (i, 0)),
        ),
        compiler_params=pltpu.CompilerParams(
            dimension_semantics=("parallel",),
            vmem_limit_bytes=vmem_limit,
        ),
        input_output_aliases=io_alias,
    )(x2, pe2)
    return out2.reshape(s, b, d)


# ------------------------------- demo ---------------------------------------


if __name__ == "__main__":
    key = jax.random.PRNGKey(0)

    # Small shapes implied by the module's forward: x is [seq_len, batch, d_model].
    seq_len, batch, d_model = 8, 2, 32
    max_len = 512

    x = jax.random.normal(key, (seq_len, batch, d_model), dtype=jnp.float32)
    pe = make_positional_encoding(d_model, max_len)

    out = positional_encoding_forward(x, pe)           # takes the 2-D lane-folded path
    out = jax.block_until_ready(out)
    assert out.shape == (seq_len, batch, d_model), out.shape
    ref = x + pe[:seq_len]
    assert jnp.allclose(out, ref, atol=1e-6, rtol=1e-6)

    # Also exercise the lane-friendly 3-D path (d % 128 == 0, batch >= 8).
    s2, b2, d2 = 64, 8, 256
    x2 = jax.random.normal(jax.random.PRNGKey(1), (s2, b2, d2), dtype=jnp.float32)
    pe2 = make_positional_encoding(d2, max_len)
    out2 = jax.block_until_ready(positional_encoding_forward(x2, pe2))
    ref2 = x2 + pe2[:s2]
    assert out2.shape == (s2, b2, d2)
    assert jnp.allclose(out2, ref2, atol=1e-6, rtol=1e-6)

    print("KERNEL_OK")
</pallas_src>

<mosaic_0001>
module attributes {stable_mosaic.version = 11 : i64} {
  func.func @_pe_add_kernel(%arg0: i32, %arg1: memref<8x64xf32, #tpu.memory_space<vmem>>, %arg2: memref<8x64xf32, #tpu.memory_space<vmem>>, %arg3: memref<8x64xf32, #tpu.memory_space<vmem>>) attributes {dimension_semantics = [#tpu.dimension_semantics<parallel>], iteration_bounds = array<i64: 1>, scalar_prefetch = 0 : i64, scratch_operands = 0 : i64, tpu.core_type = #tpu.core_type<tc>, window_params = [{transform_indices = @transform_0, window_bounds = array<i64: 8, 64>}, {transform_indices = @transform_1, window_bounds = array<i64: 8, 64>}, {transform_indices = @transform_2, window_bounds = array<i64: 8, 64>}]} {
    %c0 = arith.constant 0 : index
    %c0_0 = arith.constant 0 : index
    %0 = vector.load %arg1[%c0, %c0_0] : memref<8x64xf32, #tpu.memory_space<vmem>>, vector<8x64xf32>
    %c0_1 = arith.constant 0 : index
    %c0_2 = arith.constant 0 : index
    %1 = vector.load %arg2[%c0_1, %c0_2] : memref<8x64xf32, #tpu.memory_space<vmem>>, vector<8x64xf32>
    %2 = arith.addf %0, %1 : vector<8x64xf32>
    %c0_3 = arith.constant 0 : index
    %c0_4 = arith.constant 0 : index
    %3 = vector.load %arg3[%c0_3, %c0_4] : memref<8x64xf32, #tpu.memory_space<vmem>>, vector<8x64xf32>
    tpu.vector_store %arg3[%c0_3, %c0_4], %2 {strides = array<i32>} : memref<8x64xf32, #tpu.memory_space<vmem>>, vector<8x64xf32>,
    return
  }
  func.func @transform_0(%arg0: i32) -> (i32, i32) {
    %c0_i32 = arith.constant 0 : i32
    %c0_i32_0 = arith.constant 0 : i32
    return %arg0, %c0_i32 : i32, i32
  }
  func.func @transform_1(%arg0: i32) -> (i32, i32) {
    %c0_i32 = arith.constant 0 : i32
    %c0_i32_0 = arith.constant 0 : i32
    return %arg0, %c0_i32 : i32, i32
  }
  func.func @transform_2(%arg0: i32) -> (i32, i32) {
    %c0_i32 = arith.constant 0 : i32
    %c0_i32_0 = arith.constant 0 : i32
    return %arg0, %c0_i32 : i32, i32
  }
}

</mosaic_0001>

<bundles_post_ra>
// kernel: tpu_custom_call.1
= control target key start
LH: loop header
LB: loop body
LE: loop exit
PB: predicated region body
PF: predicated region fallthrough
CT: control target
= control target key end

     0   :  { %7 = vsyncpa [#allocation3], 0  ;;  %s171_s0 = inlined_call_operand.hbm [shape: f32[8,64], index: 0, kind: input, shape index: {}]   ;;  %s172_s1 = inlined_call_operand.hbm [shape: f32[8,64], index: 1, kind: input, shape index: {}]   ;;  %s173_s2 = inlined_call_operand.hbm [shape: f32[8,64], index: 2, kind: output, shape index: {}]  }
   0x1   :  { %8 = vsyncpa [#allocation6], 0 }
   0x2   :  { %9 = vsyncpa [#allocation4], 0  ;;  %s15_s11 = sshll.u32 %s171_s0, 4  ;;  %s144_s12 = smov [#allocation2]   ;;  %s16_s11 = int_to_ptr.hbm [resolvable:$true] %s15_s11 }
   0x3   :  { %s17_s13 = sshll.u32 %s144_s12, 4  ;;  %s26_s16 = sshll.u32 %s172_s1, 4  ;;  %s18_s13 = int_to_ptr.vmem [resolvable:$true] %s17_s13  ;;  %s27_s16 = int_to_ptr.hbm [resolvable:$true] %s26_s16 }
   0x4   :  { %20 = dma.hbm_to_vmem [thread:$0]  %s16_s11, 128, %s18_s13, [#allocation3]  }
   0x5   :  { %s145_s17 = smov [#allocation5]  }
   0x6   :  { %s28_s18 = sshll.u32 %s145_s17, 4  ;;  %s29_s18 = int_to_ptr.vmem [resolvable:$true] %s28_s18 }
   0x7   :  { %31 = dma.hbm_to_vmem [thread:$0]  %s27_s16, 128, %s29_s18, [#allocation6]  }
   0x8   :  { %138 = dma.done.wait [#allocation3], 128  }
   0x9   :  { %139 = vsyncadd [#allocation3], 4294967168 }
   0xa   :  { %140 = dma.done.wait [#allocation6], 128  }
   0xb   :  { %141 = vsyncadd [#allocation6], 4294967168  ;;  %s146_s19 = smov [#allocation7]   ;;  %s52_s22 = sshll.u32 %s173_s2, 4  ;;  %v40_v0 = vld [vmem:[#allocation2] sm:$0xff]  ;;  %v41_v1 = vld [vmem:[#allocation5] sm:$0xff]  ;;  %s53_s22 = int_to_ptr.hbm [resolvable:$true] %s52_s22 }
   0xc   :  { %s50_s0 = sshll.u32 %s146_s19, 4  ;;  %vm43_vm0 = vcmask 523264   ;;  %v42_v2 = vadd.f32 %v41_v1, %v40_v0  ;;  %s51_s0 = int_to_ptr.vmem [resolvable:$true] %s50_s0 }
   0xe   :  { %44 = vst.msk [vmem:[#allocation7] sm:$0xff] %vm43_vm0, %v42_v2 }
   0xf   :  { %55 = dma.vmem_to_hbm [thread:$0]  %s51_s0, 128, %s53_s22, [#allocation4]  }
  0x10   :  { %142 = dma.done.wait [#allocation4], 128  }
  0x11   :  { %143 = vsyncadd [#allocation4], 4294967168 }
  0x12   :  { %60 = vsyncpa [#allocation3], 1 }
  0x13   :  { %61 = vsyncpa [#allocation6], 1 }
  0x14   :  { %62 = vsyncpa [#allocation4], 1 }

</bundles_post_ra>
